<compile_context>
chip_gen: v5e
topology: v5e:2x2
jax: 0.10.0
libtpu: 0.0.40
codegen_flags: <defaults>
</compile_context>

<pallas_src>
import math
import functools

import jax
import jax.numpy as jnp
from jax.experimental import pallas as pl
from jax.experimental.pallas import tpu as pltpu


# Large finite negative instead of -inf: exp underflows to 0, no inf-inf NaNs.
DEFAULT_MASK_VALUE = -0.7 * float(jnp.finfo(jnp.float32).max)


# ---------------------------------------------------------------------------
# Kernel 1: fused QKV projection + head split.
#   (1, bm, C) @ (C, 3C) + bias  ->  q/k/v each (1, n_head, bm, hd)
# ---------------------------------------------------------------------------
def _qkv_proj_kernel(x_ref, wqkv_ref, bqkv_ref, q_ref, k_ref, v_ref, *, n_head):
    C = x_ref.shape[2]
    hd = C // n_head
    x = x_ref[0]                                              # (bm, C)
    # One wide matmul (output width 3C keeps the MXU full); f32 accumulation.
    qkv = jnp.dot(x, wqkv_ref[...], preferred_element_type=jnp.float32)
    qkv = (qkv + bqkv_ref[...]).astype(q_ref.dtype)           # (bm, 3C)
    # Head-major stores give the attention kernel full-lane (hd) blocks.
    for h in range(n_head):
        q_ref[0, h] = qkv[:, h * hd:(h + 1) * hd]
        k_ref[0, h] = qkv[:, C + h * hd:C + (h + 1) * hd]
        v_ref[0, h] = qkv[:, 2 * C + h * hd:2 * C + (h + 1) * hd]


# ---------------------------------------------------------------------------
# Kernel 2: causal flash attention (online softmax over KV tiles) with the
# output projection fused into the finalize step.
#   grid = (B, T//block_q, T//block_k), all heads per step.
# ---------------------------------------------------------------------------
def _flash_attn_fused_kernel(q_ref, k_ref, v_ref, wproj_ref, bproj_ref, o_ref,
                             m_sc, l_sc, acc_sc, ymerge_sc, *,
                             n_head, block_q, block_k, approx_recip):
    qi = pl.program_id(1)
    ki = pl.program_id(2)

    @pl.when(ki == 0)
    def _init():
        m_sc[...] = jnp.full_like(m_sc, -jnp.inf)
        l_sc[...] = jnp.zeros_like(l_sc)
        acc_sc[...] = jnp.zeros_like(acc_sc)

    def _block(masked):
        q = q_ref[0]                                          # (H, bq, hd)
        k = k_ref[0]                                          # (H, bk, hd)
        v = v_ref[0]                                          # (H, bk, hd)

        # Batched over heads; contracts the shared hd axis directly.
        # Scale is already folded into the Q projection weights.
        s = jnp.einsum("hqd,hkd->hqk", q, k,
                       preferred_element_type=jnp.float32)    # (H, bq, bk) f32

        if masked:
            row = qi * block_q + jax.lax.broadcasted_iota(
                jnp.int32, (block_q, block_k), 0)
            col = ki * block_k + jax.lax.broadcasted_iota(
                jnp.int32, (block_q, block_k), 1)
            s = jnp.where((row >= col)[None, :, :], s, DEFAULT_MASK_VALUE)

        m_prev = m_sc[...]
        m_next = jnp.maximum(m_prev, jnp.max(s, axis=-1, keepdims=True))
        alpha = jnp.exp(m_prev - m_next)
        p = jnp.exp(s - m_next)
        l_sc[...] = alpha * l_sc[...] + jnp.sum(p, axis=-1, keepdims=True)
        acc_sc[...] = alpha * acc_sc[...] + jnp.einsum(
            "hqk,hkd->hqd", p.astype(v.dtype), v,
            preferred_element_type=jnp.float32)
        m_sc[...] = m_next

    # Block classification (all static arithmetic on scalar grid ids):
    #   valid        : block has at least one element with col <= row
    #   no_mask_need : block lies entirely on/below the diagonal
    valid = ki * block_k < (qi + 1) * block_q
    no_mask_needed = qi * block_q >= (ki + 1) * block_k - 1

    @pl.when(jnp.logical_and(valid, no_mask_needed))
    def _below_diag():
        _block(masked=False)

    @pl.when(jnp.logical_and(valid, jnp.logical_not(no_mask_needed)))
    def _on_diag():
        _block(masked=True)

    @pl.when(ki == pl.num_programs(2) - 1)
    def _finalize():
        # Deferred softmax normalization: one reciprocal per row.
        if approx_recip:
            inv_l = pl.reciprocal(l_sc[...], approx=True)     # EUP slot
        else:
            inv_l = 1.0 / l_sc[...]                           # exact, f32 path
        y = acc_sc[...] * inv_l                               # (H, bq, hd) f32
        hd = acc_sc.shape[-1]
        # Merge heads into a lane-dense (bq, C) scratch (H static lane-offset
        # stores, once per q tile), then one full-contraction-depth matmul.
        for h in range(n_head):
            ymerge_sc[:, h * hd:(h + 1) * hd] = y[h].astype(ymerge_sc.dtype)
        out = jnp.dot(ymerge_sc[...], wproj_ref[...],
                      preferred_element_type=jnp.float32)     # (bq, C) f32
        o_ref[0] = (out + bproj_ref[...]).astype(o_ref.dtype)


def _fit_block(dim, target):
    """Largest block <= target that divides dim (realistic T/C are multiples
    of 128; tiny demo shapes just use the full dim)."""
    t = min(dim, target)
    while dim % t:
        t -= 1
    return t


def causal_self_attention(x, w_attn, b_attn, w_proj, b_proj, n_head, *,
                          compute_dtype=None, block_q=256, block_k=256,
                          block_m=256, vmem_limit_bytes=48 * 1024 * 1024):
    """GPT-2 causal self-attention forward.

    x: (B, T, C). Weights in PyTorch Linear layout: w_attn (3C, C),
    b_attn (3C,), w_proj (C, C), b_proj (C,). Returns (B, T, C) in x.dtype.

    compute_dtype: dtype fed to the MXU (bf16 recommended on v5e/v6e/v7x);
    softmax stats and all matmul accumulation stay f32.
    """
    B, T, C = x.shape
    assert C % n_head == 0
    hd = C // n_head
    if compute_dtype is None:
        compute_dtype = x.dtype
    compute_dtype = jnp.dtype(compute_dtype)

    bq = _fit_block(T, block_q)
    bk = _fit_block(T, block_k)
    bm = _fit_block(T, block_m)

    # PyTorch Linear computes x @ W.T + b -> pre-transpose to x @ W form.
    wqkv = jnp.asarray(w_attn).T.astype(jnp.float32)          # (C, 3C)
    wproj = jnp.asarray(w_proj).T.astype(jnp.float32)         # (C, C)
    bqkv = jnp.asarray(b_attn).astype(jnp.float32).reshape(1, 3 * C)
    bproj = jnp.asarray(b_proj).astype(jnp.float32).reshape(1, C)

    # Fold the 1/sqrt(hd) attention scale into the Q projection (one-time
    # weight transform; no per-score scaling inside the kernel).
    scale = 1.0 / math.sqrt(hd)
    wqkv = jnp.concatenate([wqkv[:, :C] * scale, wqkv[:, C:]], axis=1)
    bqkv = jnp.concatenate([bqkv[:, :C] * scale, bqkv[:, C:]], axis=1)

    x_c = jnp.asarray(x).astype(compute_dtype)
    wqkv = wqkv.astype(compute_dtype)        # bf16 weights keep resident (C,3C)
    wproj = wproj.astype(compute_dtype)      # and (C,C) small in VMEM on v7x.
    # Biases stay f32 (added to the f32 accumulators).

    qkv_head = jax.ShapeDtypeStruct((B, n_head, T, hd), compute_dtype)

    # ---- Kernel 1: QKV projection -> head-major q/k/v ----------------------
    q, k, v = pl.pallas_call(
        functools.partial(_qkv_proj_kernel, n_head=n_head),
        out_shape=(qkv_head, qkv_head, qkv_head),
        grid_spec=pltpu.PrefetchScalarGridSpec(
            num_scalar_prefetch=0,
            grid=(B, T // bm),
            in_specs=[
                pl.BlockSpec((1, bm, C), lambda b, t: (b, t, 0)),
                # Constant index maps: weight/bias blocks are not re-fetched
                # across grid steps (kept resident between iterations).
                pl.BlockSpec((C, 3 * C), lambda b, t: (0, 0)),
                pl.BlockSpec((1, 3 * C), lambda b, t: (0, 0)),
            ],
            out_specs=[
                pl.BlockSpec((1, n_head, bm, hd), lambda b, t: (b, 0, t, 0)),
                pl.BlockSpec((1, n_head, bm, hd), lambda b, t: (b, 0, t, 0)),
                pl.BlockSpec((1, n_head, bm, hd), lambda b, t: (b, 0, t, 0)),
            ]),
        compiler_params=pltpu.CompilerParams(
            dimension_semantics=("parallel", "parallel"),
            vmem_limit_bytes=vmem_limit_bytes),
    )(x_c, wqkv, bqkv)

    # ---- Kernel 2: flash attention + fused output projection ---------------
    # Clamp K/V block indices to the last causally-valid block for this q tile:
    # for ki past the diagonal the index is unchanged from the previous step,
    # so the pipelined DMA is skipped (no HBM traffic for dead blocks).
    def kv_index_map(b, qi, ki):
        last_valid = ((qi + 1) * bq - 1) // bk
        return (b, 0, jnp.minimum(ki, last_valid), 0)

    out = pl.pallas_call(
        functools.partial(
            _flash_attn_fused_kernel, n_head=n_head, block_q=bq, block_k=bk,
            approx_recip=(compute_dtype != jnp.dtype(jnp.float32))),
        out_shape=jax.ShapeDtypeStruct((B, T, C), x.dtype),
        grid_spec=pltpu.PrefetchScalarGridSpec(
            num_scalar_prefetch=0,
            grid=(B, T // bq, T // bk),
            in_specs=[
                pl.BlockSpec((1, n_head, bq, hd),
                             lambda b, qi, ki: (b, 0, qi, 0)),
                pl.BlockSpec((1, n_head, bk, hd), kv_index_map),
                pl.BlockSpec((1, n_head, bk, hd), kv_index_map),
                # Resident projection weight/bias (constant index maps).
                pl.BlockSpec((C, C), lambda b, qi, ki: (0, 0)),
                pl.BlockSpec((1, C), lambda b, qi, ki: (0, 0)),
            ],
            # Lane-dense (bq, C) output block, written once at finalize.
            out_specs=pl.BlockSpec((1, bq, C), lambda b, qi, ki: (b, qi, 0)),
            scratch_shapes=[
                pltpu.VMEM((n_head, bq, 1), jnp.float32),   # running max m
                pltpu.VMEM((n_head, bq, 1), jnp.float32),   # running sum l
                pltpu.VMEM((n_head, bq, hd), jnp.float32),  # unnormalized acc
                pltpu.VMEM((bq, C), compute_dtype),         # merged heads
            ]),
        compiler_params=pltpu.CompilerParams(
            dimension_semantics=("parallel", "parallel", "arbitrary"),
            vmem_limit_bytes=vmem_limit_bytes),
    )(q, k, v, wproj, bproj)

    return out


def _reference(x, w_attn, b_attn, w_proj, b_proj, n_head):
    """Plain-JAX reference mirroring the PyTorch forward."""
    B, T, C = x.shape
    hd = C // n_head
    qkv = x @ w_attn.T + b_attn                       # (B, T, 3C)
    q, k, v = jnp.split(qkv, 3, axis=2)
    q = q.reshape(B, T, n_head, hd).transpose(0, 2, 1, 3)
    k = k.reshape(B, T, n_head, hd).transpose(0, 2, 1, 3)
    v = v.reshape(B, T, n_head, hd).transpose(0, 2, 1, 3)
    s = jnp.einsum("bhqd,bhkd->bhqk", q, k) / math.sqrt(hd)
    mask = jnp.tril(jnp.ones((T, T), dtype=bool))
    s = jnp.where(mask[None, None], s, -jnp.inf)
    p = jax.nn.softmax(s, axis=-1)
    y = jnp.einsum("bhqk,bhkd->bhqd", p, v)
    y = y.transpose(0, 2, 1, 3).reshape(B, T, C)
    return y @ w_proj.T + b_proj


if __name__ == "__main__":
    # Small synthetic config: n_embd=32, n_head=4, seq=8, batch=2.
    B, T, C, n_head = 2, 8, 32, 4

    key = jax.random.PRNGKey(0)
    kx, kw1, kb1, kw2, kb2 = jax.random.split(key, 5)

    x = jax.random.normal(kx, (B, T, C), dtype=jnp.float32)
    # PyTorch Linear shapes: weight (out_features, in_features).
    w_attn = jax.random.normal(kw1, (3 * C, C), dtype=jnp.float32) * 0.02
    b_attn = jax.random.normal(kb1, (3 * C,), dtype=jnp.float32) * 0.02
    w_proj = jax.random.normal(kw2, (C, C), dtype=jnp.float32) * 0.02
    b_proj = jax.random.normal(kb2, (C,), dtype=jnp.float32) * 0.02

    y_ref = _reference(x, w_attn, b_attn, w_proj, b_proj, n_head)

    # f32 data path: tight tolerance vs reference.
    y = causal_self_attention(x, w_attn, b_attn, w_proj, b_proj, n_head)
    y = jax.block_until_ready(y)
    assert jnp.allclose(y, y_ref, atol=2e-5, rtol=2e-5), "f32 mismatch vs reference"

    # bf16 MXU data path (recommended on v5e/v6e/v7x); accumulation stays f32.
    y16 = causal_self_attention(x, w_attn, b_attn, w_proj, b_proj, n_head,
                                compute_dtype=jnp.bfloat16)
    y16 = jax.block_until_ready(y16)
    assert jnp.allclose(y16.astype(jnp.float32), y_ref, atol=5e-2, rtol=5e-2), \
        "bf16 mismatch vs reference"

    print("KERNEL_OK")
</pallas_src>

<mosaic_0001>
module attributes {stable_mosaic.version = 11 : i64} {
  func.func @_qkv_proj_kernel(%arg0: i32, %arg1: i32, %arg2: memref<1x8x32xf32, #tpu.memory_space<vmem>>, %arg3: memref<32x96xf32, #tpu.memory_space<vmem>>, %arg4: memref<1x96xf32, #tpu.memory_space<vmem>>, %arg5: memref<1x4x8x8xf32, #tpu.memory_space<vmem>>, %arg6: memref<1x4x8x8xf32, #tpu.memory_space<vmem>>, %arg7: memref<1x4x8x8xf32, #tpu.memory_space<vmem>>) attributes {dimension_semantics = [#tpu.dimension_semantics<parallel>, #tpu.dimension_semantics<parallel>], iteration_bounds = array<i64: 2, 1>, scalar_prefetch = 0 : i64, scratch_operands = 0 : i64, tpu.core_type = #tpu.core_type<tc>, window_params = [{transform_indices = @transform_0, window_bounds = array<i64: 1, 8, 32>}, {pipeline_mode = #tpu.pipeline_mode<synchronous>, transform_indices = @transform_1, window_bounds = array<i64: 32, 96>}, {pipeline_mode = #tpu.pipeline_mode<synchronous>, transform_indices = @transform_2, window_bounds = array<i64: 1, 96>}, {transform_indices = @transform_3, window_bounds = array<i64: 1, 4, 8, 8>}, {transform_indices = @transform_4, window_bounds = array<i64: 1, 4, 8, 8>}, {transform_indices = @transform_5, window_bounds = array<i64: 1, 4, 8, 8>}]} {
    %c0 = arith.constant 0 : index
    %c0_0 = arith.constant 0 : index
    %c0_1 = arith.constant 0 : index
    %0 = vector.load %arg2[%c0, %c0_0, %c0_1] : memref<1x8x32xf32, #tpu.memory_space<vmem>>, vector<1x8x32xf32>
    %1 = vector.shape_cast %0 : vector<1x8x32xf32> to vector<8x32xf32>
    %c0_2 = arith.constant 0 : index
    %c0_3 = arith.constant 0 : index
    %2 = vector.load %arg3[%c0_2, %c0_3] : memref<32x96xf32, #tpu.memory_space<vmem>>, vector<32x96xf32>
    %cst = arith.constant dense<0.000000e+00> : vector<8x96xf32>
    %3 = tpu.matmul %1, %2, %cst {dimension_numbers = #tpu.dot_dimension_numbers<[1], [0], [0], [1], [0, 0, 1, 1], [], []>} : vector<8x32xf32>, vector<32x96xf32>, vector<8x96xf32> -> vector<8x96xf32>
    %c0_4 = arith.constant 0 : index
    %c0_5 = arith.constant 0 : index
    %4 = vector.load %arg4[%c0_4, %c0_5] : memref<1x96xf32, #tpu.memory_space<vmem>>, vector<1x96xf32>
    %5 = vector.broadcast %4 : vector<1x96xf32> to vector<8x96xf32>
    %6 = arith.addf %3, %5 : vector<8x96xf32>
    %7 = vector.extract_strided_slice %6 {offsets = [0, 0], sizes = [8, 8], strides = [1, 1]} : vector<8x96xf32> to vector<8x8xf32>
    %c0_6 = arith.constant 0 : index
    %c0_7 = arith.constant 0 : index
    %c0_8 = arith.constant 0 : index
    %c0_9 = arith.constant 0 : index
    %8 = vector.load %arg5[%c0_6, %c0_7, %c0_8, %c0_9] : memref<1x4x8x8xf32, #tpu.memory_space<vmem>>, vector<1x1x8x8xf32>
    %9 = vector.shape_cast %8 : vector<1x1x8x8xf32> to vector<8x8xf32>
    %10 = vector.shape_cast %7 : vector<8x8xf32> to vector<1x1x8x8xf32>
    tpu.vector_store %arg5[%c0_6, %c0_7, %c0_8, %c0_9], %10 {strides = array<i32>} : memref<1x4x8x8xf32, #tpu.memory_space<vmem>>, vector<1x1x8x8xf32>,
    %11 = vector.extract_strided_slice %6 {offsets = [0, 32], sizes = [8, 8], strides = [1, 1]} : vector<8x96xf32> to vector<8x8xf32>
    %c0_10 = arith.constant 0 : index
    %c0_11 = arith.constant 0 : index
    %c0_12 = arith.constant 0 : index
    %c0_13 = arith.constant 0 : index
    %12 = vector.load %arg6[%c0_10, %c0_11, %c0_12, %c0_13] : memref<1x4x8x8xf32, #tpu.memory_space<vmem>>, vector<1x1x8x8xf32>
    %13 = vector.shape_cast %12 : vector<1x1x8x8xf32> to vector<8x8xf32>
    %14 = vector.shape_cast %11 : vector<8x8xf32> to vector<1x1x8x8xf32>
    tpu.vector_store %arg6[%c0_10, %c0_11, %c0_12, %c0_13], %14 {strides = array<i32>} : memref<1x4x8x8xf32, #tpu.memory_space<vmem>>, vector<1x1x8x8xf32>,
    %15 = vector.extract_strided_slice %6 {offsets = [0, 64], sizes = [8, 8], strides = [1, 1]} : vector<8x96xf32> to vector<8x8xf32>
    %c0_14 = arith.constant 0 : index
    %c0_15 = arith.constant 0 : index
    %c0_16 = arith.constant 0 : index
    %c0_17 = arith.constant 0 : index
    %16 = vector.load %arg7[%c0_14, %c0_15, %c0_16, %c0_17] : memref<1x4x8x8xf32, #tpu.memory_space<vmem>>, vector<1x1x8x8xf32>
    %17 = vector.shape_cast %16 : vector<1x1x8x8xf32> to vector<8x8xf32>
    %18 = vector.shape_cast %15 : vector<8x8xf32> to vector<1x1x8x8xf32>
    tpu.vector_store %arg7[%c0_14, %c0_15, %c0_16, %c0_17], %18 {strides = array<i32>} : memref<1x4x8x8xf32, #tpu.memory_space<vmem>>, vector<1x1x8x8xf32>,
    %19 = vector.extract_strided_slice %6 {offsets = [0, 8], sizes = [8, 8], strides = [1, 1]} : vector<8x96xf32> to vector<8x8xf32>
    %c0_18 = arith.constant 0 : index
    %c1 = arith.constant 1 : index
    %c0_19 = arith.constant 0 : index
    %c0_20 = arith.constant 0 : index
    %20 = vector.load %arg5[%c0_18, %c1, %c0_19, %c0_20] : memref<1x4x8x8xf32, #tpu.memory_space<vmem>>, vector<1x1x8x8xf32>
    %21 = vector.shape_cast %20 : vector<1x1x8x8xf32> to vector<8x8xf32>
    %22 = vector.shape_cast %19 : vector<8x8xf32> to vector<1x1x8x8xf32>
    tpu.vector_store %arg5[%c0_18, %c1, %c0_19, %c0_20], %22 {strides = array<i32>} : memref<1x4x8x8xf32, #tpu.memory_space<vmem>>, vector<1x1x8x8xf32>,
    %23 = vector.extract_strided_slice %6 {offsets = [0, 40], sizes = [8, 8], strides = [1, 1]} : vector<8x96xf32> to vector<8x8xf32>
    %c0_21 = arith.constant 0 : index
    %c1_22 = arith.constant 1 : index
    %c0_23 = arith.constant 0 : index
    %c0_24 = arith.constant 0 : index
    %24 = vector.load %arg6[%c0_21, %c1_22, %c0_23, %c0_24] : memref<1x4x8x8xf32, #tpu.memory_space<vmem>>, vector<1x1x8x8xf32>
    %25 = vector.shape_cast %24 : vector<1x1x8x8xf32> to vector<8x8xf32>
    %26 = vector.shape_cast %23 : vector<8x8xf32> to vector<1x1x8x8xf32>
    tpu.vector_store %arg6[%c0_21, %c1_22, %c0_23, %c0_24], %26 {strides = array<i32>} : memref<1x4x8x8xf32, #tpu.memory_space<vmem>>, vector<1x1x8x8xf32>,
    %27 = vector.extract_strided_slice %6 {offsets = [0, 72], sizes = [8, 8], strides = [1, 1]} : vector<8x96xf32> to vector<8x8xf32>
    %c0_25 = arith.constant 0 : index
    %c1_26 = arith.constant 1 : index
    %c0_27 = arith.constant 0 : index
    %c0_28 = arith.constant 0 : index
    %28 = vector.load %arg7[%c0_25, %c1_26, %c0_27, %c0_28] : memref<1x4x8x8xf32, #tpu.memory_space<vmem>>, vector<1x1x8x8xf32>
    %29 = vector.shape_cast %28 : vector<1x1x8x8xf32> to vector<8x8xf32>
    %30 = vector.shape_cast %27 : vector<8x8xf32> to vector<1x1x8x8xf32>
    tpu.vector_store %arg7[%c0_25, %c1_26, %c0_27, %c0_28], %30 {strides = array<i32>} : memref<1x4x8x8xf32, #tpu.memory_space<vmem>>, vector<1x1x8x8xf32>,
    %31 = vector.extract_strided_slice %6 {offsets = [0, 16], sizes = [8, 8], strides = [1, 1]} : vector<8x96xf32> to vector<8x8xf32>
    %c0_29 = arith.constant 0 : index
    %c2 = arith.constant 2 : index
    %c0_30 = arith.constant 0 : index
    %c0_31 = arith.constant 0 : index
    %32 = vector.load %arg5[%c0_29, %c2, %c0_30, %c0_31] : memref<1x4x8x8xf32, #tpu.memory_space<vmem>>, vector<1x1x8x8xf32>
    %33 = vector.shape_cast %32 : vector<1x1x8x8xf32> to vector<8x8xf32>
    %34 = vector.shape_cast %31 : vector<8x8xf32> to vector<1x1x8x8xf32>
    tpu.vector_store %arg5[%c0_29, %c2, %c0_30, %c0_31], %34 {strides = array<i32>} : memref<1x4x8x8xf32, #tpu.memory_space<vmem>>, vector<1x1x8x8xf32>,
    %35 = vector.extract_strided_slice %6 {offsets = [0, 48], sizes = [8, 8], strides = [1, 1]} : vector<8x96xf32> to vector<8x8xf32>
    %c0_32 = arith.constant 0 : index
    %c2_33 = arith.constant 2 : index
    %c0_34 = arith.constant 0 : index
    %c0_35 = arith.constant 0 : index
    %36 = vector.load %arg6[%c0_32, %c2_33, %c0_34, %c0_35] : memref<1x4x8x8xf32, #tpu.memory_space<vmem>>, vector<1x1x8x8xf32>
    %37 = vector.shape_cast %36 : vector<1x1x8x8xf32> to vector<8x8xf32>
    %38 = vector.shape_cast %35 : vector<8x8xf32> to vector<1x1x8x8xf32>
    tpu.vector_store %arg6[%c0_32, %c2_33, %c0_34, %c0_35], %38 {strides = array<i32>} : memref<1x4x8x8xf32, #tpu.memory_space<vmem>>, vector<1x1x8x8xf32>,
    %39 = vector.extract_strided_slice %6 {offsets = [0, 80], sizes = [8, 8], strides = [1, 1]} : vector<8x96xf32> to vector<8x8xf32>
    %c0_36 = arith.constant 0 : index
    %c2_37 = arith.constant 2 : index
    %c0_38 = arith.constant 0 : index
    %c0_39 = arith.constant 0 : index
    %40 = vector.load %arg7[%c0_36, %c2_37, %c0_38, %c0_39] : memref<1x4x8x8xf32, #tpu.memory_space<vmem>>, vector<1x1x8x8xf32>
    %41 = vector.shape_cast %40 : vector<1x1x8x8xf32> to vector<8x8xf32>
    %42 = vector.shape_cast %39 : vector<8x8xf32> to vector<1x1x8x8xf32>
    tpu.vector_store %arg7[%c0_36, %c2_37, %c0_38, %c0_39], %42 {strides = array<i32>} : memref<1x4x8x8xf32, #tpu.memory_space<vmem>>, vector<1x1x8x8xf32>,
    %43 = vector.extract_strided_slice %6 {offsets = [0, 24], sizes = [8, 8], strides = [1, 1]} : vector<8x96xf32> to vector<8x8xf32>
    %c0_40 = arith.constant 0 : index
    %c3 = arith.constant 3 : index
    %c0_41 = arith.constant 0 : index
    %c0_42 = arith.constant 0 : index
    %44 = vector.load %arg5[%c0_40, %c3, %c0_41, %c0_42] : memref<1x4x8x8xf32, #tpu.memory_space<vmem>>, vector<1x1x8x8xf32>
    %45 = vector.shape_cast %44 : vector<1x1x8x8xf32> to vector<8x8xf32>
    %46 = vector.shape_cast %43 : vector<8x8xf32> to vector<1x1x8x8xf32>
    tpu.vector_store %arg5[%c0_40, %c3, %c0_41, %c0_42], %46 {strides = array<i32>} : memref<1x4x8x8xf32, #tpu.memory_space<vmem>>, vector<1x1x8x8xf32>,
    %47 = vector.extract_strided_slice %6 {offsets = [0, 56], sizes = [8, 8], strides = [1, 1]} : vector<8x96xf32> to vector<8x8xf32>
    %c0_43 = arith.constant 0 : index
    %c3_44 = arith.constant 3 : index
    %c0_45 = arith.constant 0 : index
    %c0_46 = arith.constant 0 : index
    %48 = vector.load %arg6[%c0_43, %c3_44, %c0_45, %c0_46] : memref<1x4x8x8xf32, #tpu.memory_space<vmem>>, vector<1x1x8x8xf32>
    %49 = vector.shape_cast %48 : vector<1x1x8x8xf32> to vector<8x8xf32>
    %50 = vector.shape_cast %47 : vector<8x8xf32> to vector<1x1x8x8xf32>
    tpu.vector_store %arg6[%c0_43, %c3_44, %c0_45, %c0_46], %50 {strides = array<i32>} : memref<1x4x8x8xf32, #tpu.memory_space<vmem>>, vector<1x1x8x8xf32>,
    %51 = vector.extract_strided_slice %6 {offsets = [0, 88], sizes = [8, 8], strides = [1, 1]} : vector<8x96xf32> to vector<8x8xf32>
    %c0_47 = arith.constant 0 : index
    %c3_48 = arith.constant 3 : index
    %c0_49 = arith.constant 0 : index
    %c0_50 = arith.constant 0 : index
    %52 = vector.load %arg7[%c0_47, %c3_48, %c0_49, %c0_50] : memref<1x4x8x8xf32, #tpu.memory_space<vmem>>, vector<1x1x8x8xf32>
    %53 = vector.shape_cast %52 : vector<1x1x8x8xf32> to vector<8x8xf32>
    %54 = vector.shape_cast %51 : vector<8x8xf32> to vector<1x1x8x8xf32>
    tpu.vector_store %arg7[%c0_47, %c3_48, %c0_49, %c0_50], %54 {strides = array<i32>} : memref<1x4x8x8xf32, #tpu.memory_space<vmem>>, vector<1x1x8x8xf32>,
    return
  }
  func.func @transform_0(%arg0: i32, %arg1: i32) -> (i32, i32, i32) {
    %c0_i32 = arith.constant 0 : i32
    %c0_i32_0 = arith.constant 0 : i32
    return %arg0, %arg1, %c0_i32 : i32, i32, i32
  }
  func.func @transform_1(%arg0: i32, %arg1: i32) -> (i32, i32) {
    %c0_i32 = arith.constant 0 : i32
    %c0_i32_0 = arith.constant 0 : i32
    %c0_i32_1 = arith.constant 0 : i32
    return %c0_i32, %c0_i32_0 : i32, i32
  }
  func.func @transform_2(%arg0: i32, %arg1: i32) -> (i32, i32) {
    %c0_i32 = arith.constant 0 : i32
    %c0_i32_0 = arith.constant 0 : i32
    %c0_i32_1 = arith.constant 0 : i32
    return %c0_i32, %c0_i32_0 : i32, i32
  }
  func.func @transform_3(%arg0: i32, %arg1: i32) -> (i32, i32, i32, i32) {
    %c0_i32 = arith.constant 0 : i32
    %c0_i32_0 = arith.constant 0 : i32
    %c0_i32_1 = arith.constant 0 : i32
    return %arg0, %c0_i32, %arg1, %c0_i32_0 : i32, i32, i32, i32
  }
  func.func @transform_4(%arg0: i32, %arg1: i32) -> (i32, i32, i32, i32) {
    %c0_i32 = arith.constant 0 : i32
    %c0_i32_0 = arith.constant 0 : i32
    %c0_i32_1 = arith.constant 0 : i32
    return %arg0, %c0_i32, %arg1, %c0_i32_0 : i32, i32, i32, i32
  }
  func.func @transform_5(%arg0: i32, %arg1: i32) -> (i32, i32, i32, i32) {
    %c0_i32 = arith.constant 0 : i32
    %c0_i32_0 = arith.constant 0 : i32
    %c0_i32_1 = arith.constant 0 : i32
    return %arg0, %c0_i32, %arg1, %c0_i32_0 : i32, i32, i32, i32
  }
}

</mosaic_0001>

<bundles_post_ra>
// kernel: tpu_custom_call.1
= control target key start
LH: loop header
LB: loop body
LE: loop exit
PB: predicated region body
PF: predicated region fallthrough
CT: control target
= control target key end

     0   :  { %s1241_s0 = inlined_call_operand.hbm [shape: f32[2,8,32], index: 0, kind: input, shape index: {}]   ;;  %s1242_s1 = inlined_call_operand.hbm [shape: f32[32,96], index: 1, kind: input, shape index: {}]   ;;  %s1243_s2 = inlined_call_operand.vmem [shape: f32[1,96], index: 2, kind: input, shape index: {}]   ;;  %s1244_s3 = inlined_call_operand.hbm [shape: f32[2,4,8,8], index: 3, kind: output, shape index: {0}]   ;;  %s1245_s4 = inlined_call_operand.hbm [shape: f32[2,4,8,8], index: 4, kind: output, shape index: {1}]   ;;  %s1246_s5 = inlined_call_operand.hbm [shape: f32[2,4,8,8], index: 5, kind: output, shape index: {2}]  }
   0x1   :  { %1250 = sst [smem:[#allocation15_spill]] %s1241_s0 }
   0x2   :  { %11 = vsyncpa [#allocation3], 0 }
   0x3   :  { %13 = vsyncpa [#allocation3 + $0x1], 0 }
   0x4   :  { %14 = vsyncpa [#allocation6], 0 }
   0x5   :  { %15 = vsyncpa [#allocation4], 0 }
   0x6   :  { %17 = vsyncpa [#allocation4 + $0x1], 0 }
   0x7   :  { %18 = vsyncpa [#allocation9], 0 }
   0x8   :  { %20 = vsyncpa [#allocation9 + $0x1], 0  ;;  %s1001_s18 = smov 0   ;;  %s1003_s19 = smov 0  }
   0x9   :  { %s1005_s20 = smov 0   ;;  %s1007_s21 = smov 0  }
   0xa   :  { %s1009_s22 = smov 0   ;;  %s1011_s23 = smov 0  }
   0xb LB: > { %s1032_s24 = sadd.s32 4294967295, %s953_s23   ;;  %p613_p0 = scmp.ge.s32.totalorder %s953_s23, 1  ;;  %s953_s23 = sphi %s1011_s23, %s26_s23   ;;  %s949_s22 = sphi %s1009_s22, %s1263_s22   ;;  %s945_s21 = sphi %s1007_s21, %s1262_s21   ;;  %s941_s20 = sphi %s1005_s20, %s1261_s20   ;;  %s937_s19 = sphi %s1003_s19, %s1260_s19   ;;  %s933_s18 = sphi %s1001_s18, %s1259_s18  }
   0xc   : > { %p61_p1 = scmp.eq.s32.totalorder %s1032_s24, 0  ;;  %p197_p2 = scmp.lt.s32.totalorder %s953_s23, 3 }
   0xd   : > { %s208_s27 = sshll.u32 %s1242_s1, 4  ;;  %s955_s29 = smov [#allocation5]   ;;  %s209_s27 = int_to_ptr.hbm [resolvable:$true] %s208_s27 }
   0xe   : > { %p1040_p3 = pnand %p613_p0, %p197_p2  ;;  %s210_s30 = sshll.u32 %s955_s29, 4  ;;  %s211_s30 = int_to_ptr.vmem [resolvable:$true] %s210_s30 }
   0xf   : > { %p615_p6 = scmp.ge.s32.totalorder %s953_s23, 2  ;;  %s956_s6 = smov 128  }
  0x10   : > { %p660_p4 = pneg %p1040_p3  ;;  %s957_s7 = smov 8  }
  0x11   : > { %s1247_s8 = sadd.s32 4294967294, %s953_s23   ;;  %s38_s9 = sadd.s32 1, %s949_s22 }
  0x12   : > { %p661_p5 = pnand %p660_p4, %p61_p1  ;;  %s47_s10 = sadd.s32 1, %s941_s20 }
  0x13   : > { %p40_p7 = scmp.ge.s32.totalorder %s38_s9, 2  ;;  %p54_p8 = scmp.ne.s32.totalorder %s941_s20, %s937_s19 }
  0x14   : > { %663 = dma.hbm_to_vmem [thread:$0]  (!%p661_p5), %s209_s27, 512, %s211_s30, [#allocation6], %s956_s6, %s956_s6, %s957_s7  }
  0x15   : > { %p55_p9 = scmp.eq.s32.totalorder %s953_s23, 0  ;;  %p60_p10 = scmp.ne.s32.totalorder %s937_s19, %s933_s18 }
  0x16   : > { %s1265_s9 = smov (%p40_p7, %s38_s9), 0  ;;  %p128_p13 = scmp.eq.s32.totalorder %s1032_s24, 1 }
  0x17   : > { %p1059_p11 = por %p55_p9, %p54_p8  ;;  %p1065_p12 = por %p61_p1, %p60_p10 }
  0x18   : > { %s42_s13 = ssub.s32 %s949_s22, %s1265_s9  ;;  %p134_p2 = scmp.eq.s32.totalorder %s1247_s8, 1 }
  0x19   : > { %p45_p0 = scmp.eq.s32.totalorder %s42_s13, 0  ;;  %p1074_p4 = por %p128_p13, %p54_p8 }
  0x1a   : > { %p679_p5 = scmp.lt.s32.totalorder %s953_s23, 2  ;;  %p1082_p7 = por %p134_p2, %p60_p10 }
  0x1b   : > { %s1080_s15 = scalar_select %p45_p0, %s941_s20, %s47_s10  }
  0x1c   : > { %s227_s17 = sand.u32 1, %s941_s20   ;;  %s617_s26 = sshll.u32 %s949_s22, 3 }
  0x1d   : > { %s616_s25 = sshll.u32 %s227_s17, 3  ;;  %s1256_s0 = sld [smem:[#allocation15_spill]] }
  0x1e   : > { %s231_s6 = scalar_lea.vmem [#allocation2], %s616_s25  ;;  %p665_p8 = pnand %p679_p5, %p1059_p11 }
  0x1f   : > { %s240_s7 = sshll.u32 %s231_s6, 4  ;;  %s228_s10 = scalar_lea.sflag [#allocation3], %s227_s17  ;;  %s241_s7 = int_to_ptr.vmem [resolvable:$true] %s240_s7 }
  0x20   : > { %s1096_s8 = sand.u32 (!%p1040_p3), 1, %s937_s19  }
  0x21   : > { %249 = sbr.rel (%p1040_p3) target bundleno = 332 (0x14c), region = 32  ;;  %s619_s27 = sshll.u32 (!%p1040_p3), %s1096_s8, 3 }
  0x22   : > { %s255_s25 = scalar_lea.vmem (!%p1040_p3), [#allocation2], %s619_s27 }
  0x23   : > { %s236_s30 = scalar_lea.hbm %s1256_s0, %s617_s26  ;;  %s252_s26 = scalar_lea.sflag (!%p1040_p3), [#allocation3], %s1096_s8 }
  0x24   : > { %s238_s13 = sshll.u32 %s236_s30, 4  ;;  %s239_s13 = int_to_ptr.hbm [resolvable:$true] %s238_s13 }
  0x25   : > { %667 = dma.hbm_to_vmem [thread:$0]  (!%p665_p8), %s239_s13, 128, %s241_s7, %s228_s10  }
  0x26   : > { %916 = dma.done.wait (%p1065_p12), %s252_s26, 128  }
  0x27   : > { %918 = vsyncadd (%p1065_p12), %s252_s26, 4294967168 }
  0x28   : > { %920 = dma.done.wait (%p61_p1), [#allocation6], 512  }
  0x29   : > { %922 = vsyncadd (%p61_p1), [#allocation6], 4294966784  ;;  %v302_v0 = vld [vmem:[#allocation5 + $0x18] sm:$0xff]  ;;  %v301_v1 = vld [vmem:[#allocation5 + $0x10] sm:$0xff]  ;;  %vm307_vm0 = vcmask 261120   ;;  %s1112_s12 = sshll.u32 %s1096_s8, 5 }
  0x2a   : > { %323 = vmatpush.msra.mxu0 %v302_v0  ;;  %v300_v2 = vld [vmem:[#allocation5 + $0x8] sm:$0xff]  ;;  %v299_v3 = vld [vmem:[#allocation5] sm:$0xff]  ;;  %v298_v4 = vld [vmem:[%s255_s25] sm:$0xff]  ;;  %vm331_vm1 = vcmask 64512   ;;  %s958_s17 = smov 64   ;;  %s959_s29 = smov 80  }
  0x2b   : > { %v746_v5 = vld [vmem:[%s1243_s2] ss:$0 sm:$0xff]  ;;  %s1115_s30 = scalar_lea.vmem [#allocation7], %s1112_s12  ;;  %s960_s6 = smov 96  }
  0x2c   : > { %324 = vmatpush.msra.mxu0 %v301_v1  ;;  %s961_s7 = smov 120   ;;  %s962_s13 = smov 72  }
  0x2d   : > { %s963_s10 = smov 88   ;;  %s964_s27 = smov 48  }
  0x2e   : > { %325 = vmatpush.msra.mxu0 %v300_v2  ;;  %s965_s26 = smov 112   ;;  %s966_s25 = smov 56  }
  0x2f   : > { %s967_s28 = smov 40   ;;  %s968_s11 = smov 104  }
  0x30   : > { %326 = vmatpush.msra.mxu0 %v299_v3 }
  0x31   : > { %624 = vmatmul.msk.f32.vlgmr.msra.gmra.mxu0 %vm307_vm0, %v298_v4 }
  0xae   : > { %v328_v6 = vpop.f32.mrf.mxu0 }
  0xaf   : > { %v329_v7 = vadd.f32 %v746_v5, %v328_v6 }
  0xb1   : > { %338 = vrot.lane.b32.xlu2 %v329_v7, %s958_s17  ;;  %362 = vrot.lane.b32.xlu1 %v329_v7, %s959_s29  ;;  %332 = vst.msk [vmem:[%s1115_s30] sm:$0xff] %vm331_vm1, %v329_v7  ;;  %s1120_s17 = scalar_lea.vmem [#allocation10], %s1112_s12  ;;  %s1129_s29 = sshll.u32 %s945_s21, 5 }
  0xb2   : > { %334 = vrot.lane.b32.xlu0 %v329_v7, %s960_s6  ;;  %s290_s6 = scalar_lea.vmem [#allocation8], %s1112_s12 }
  0xb9   : > { %342 = vrot.lane.b32.xlu2 %v329_v7, %s961_s7  ;;  %377 = vrot.lane.b32.xlu1 %v329_v7, %s962_s13  ;;  %s827_s7 = scalar_lea.hbm %s1245_s4, 64 }
  0xba   : > { %347 = vrot.lane.b32.xlu0 %v329_v7, %s963_s10  ;;  %s428_s10 = scalar_lea.hbm %s1245_s4, %s1129_s29 }
  0xc1   : > { %367 = vrot.lane.b32.xlu2 %v329_v7, %s964_s27  ;;  %357 = vrot.lane.b32.xlu1 %v329_v7, %s965_s26  ;;  %s429_s27 = sshll.u32 %s290_s6, 4  ;;  %s392_s26 = sand.u32 1, %s1032_s24   ;;  %s430_s27 = int_to_ptr.vmem [resolvable:$true] %s429_s27 }
  0xc2   : > { %352 = vrot.lane.b32.xlu0 %v329_v7, %s966_s25  ;;  %s431_s25 = sshll.u32 %s428_s10, 4  ;;  %s1141_s21 = scalar_lea.sflag [#allocation9], %s392_s26  ;;  %s432_s25 = int_to_ptr.hbm [resolvable:$true] %s431_s25 }
  0xc3   : > { %s821_s12 = sshra.s32 %s432_s25, 4  ;;  %s822_s12 = int_to_ptr.hbm [resolvable:$true] %s821_s12 }
  0xc4   : > { %p828_p10 = scmp.lt.s32.totalorder %s822_s12, %s1245_s4 }
  0xc9   : > { %382 = vrot.lane.b32.xlu1 %v329_v7, %s967_s28  ;;  %s823_s28 = scalar_lea.hbm %s822_s12, 32 }
  0xca   : > { %372 = vrot.lane.b32.xlu0 %v329_v7, %s968_s11  ;;  %p824_p1 = scmp.ne.s32.totalorder %s822_s12, %s823_s28  ;;  %p829_p11 = scmp.lt.s32.totalorder %s827_s7, %s823_s28 }
  0xcc   : > { %p825_p3 = pnand %p824_p1, %p1074_p4  ;;  %p830_p12 = por %p829_p11, %p828_p10 }
  0xce   : > { %p826_p9 = pneg %p825_p3 }
  0xd0   : > { %p831_p13 = pnand %p830_p12, %p826_p9 }
 0x10b   : > { %v339_v8 = vpop.permute.xlu2 %338 }
 0x10c   : > { %341 = vst.msk [vmem:[%s1120_s17] sm:$0xff] %vm331_vm1, %v339_v8 }
 0x113   : > { %v343_v9 = vpop.permute.xlu2 %342 }
 0x114   : > { %625 = vst.msk [vmem:[%s1115_s30 + $0x8] sm:$0xff] %vm331_vm1, %v343_v9 }
 0x11b   : > { %v368_v10 = vpop.permute.xlu2 %367 }
 0x11c   : > { %630 = vst.msk [vmem:[%s1120_s17 + $0x10] sm:$0xff] %vm331_vm1, %v368_v10 }
 0x123   : > { %v363_v11 = vpop.permute.xlu1 %362 }
 0x124   : > { %629 = vst.msk [vmem:[%s290_s6 + $0x10] sm:$0xff] %vm331_vm1, %v363_v11  ;;  %v335_v12 = vpop.permute.xlu0 %334 }
 0x125   : > { %337 = vst.msk [vmem:[%s290_s6] sm:$0xff] %vm331_vm1, %v335_v12 }
 0x12b   : > { %v378_v13 = vpop.permute.xlu1 %377 }
 0x12c   : > { %632 = vst.msk [vmem:[%s290_s6 + $0x18] sm:$0xff] %vm331_vm1, %v378_v13  ;;  %v348_v14 = vpop.permute.xlu0 %347 }
 0x12d   : > { %626 = vst.msk [vmem:[%s290_s6 + $0x8] sm:$0xff] %vm331_vm1, %v348_v14 }
 0x12e   : > { %834 = shalt.err (!%p831_p13)
}
 0x12f   : > { %s1248_s6 = smov 128   ;;  %s970_s26 = smov 8  }
 0x130   : > { %655 = dma.vmem_to_hbm [thread:$0]  (%p1074_p4), %s430_s27, 512, %s432_s25, %s1141_s21, %s1248_s6, %s1248_s6, %s970_s26  }
 0x131   : > { %s410_s11 = scalar_lea.hbm %s1244_s3, %s1129_s29  ;;  %s446_s13 = scalar_lea.hbm %s1246_s5, %s1129_s29 }
 0x132   : > { %s411_s10 = sshll.u32 %s1115_s30, 4  ;;  %s1170_s0 = sshll.u32 %s410_s11, 4  ;;  %s412_s10 = int_to_ptr.vmem [resolvable:$true] %s411_s10  ;;  %s414_s0 = int_to_ptr.hbm [resolvable:$true] %s1170_s0 }
 0x133   : > { %v358_v15 = vpop.permute.xlu1 %357  ;;  %s447_s27 = sshll.u32 %s1120_s17, 4  ;;  %s1173_s25 = sshll.u32 %s446_s13, 4  ;;  %s1176_s27 = int_to_ptr.vmem [resolvable:$true] %s447_s27  ;;  %s450_s25 = int_to_ptr.hbm [resolvable:$true] %s1173_s25 }
 0x134   : > { %628 = vst.msk [vmem:[%s1115_s30 + $0x10] sm:$0xff] %vm331_vm1, %v358_v15  ;;  %v353_v16 = vpop.permute.xlu0 %352  ;;  %s388_s29 = scalar_lea.sflag [#allocation4], %s1096_s8  ;;  %s849_s12 = sshra.s32 %s414_s0, 4  ;;  %s850_s12 = int_to_ptr.hbm [resolvable:$true] %s849_s12 }
 0x135   : > { %627 = vst.msk [vmem:[%s1120_s17 + $0x8] sm:$0xff] %vm331_vm1, %v353_v16  ;;  %s851_s28 = scalar_lea.hbm %s850_s12, 32  ;;  %s855_s7 = scalar_lea.hbm %s1244_s3, 64 }
 0x136   : > { %p852_p0 = scmp.ne.s32.totalorder %s850_s12, %s851_s28  ;;  %p856_p8 = scmp.lt.s32.totalorder %s850_s12, %s1244_s3 }
 0x137   : > { %p857_p1 = scmp.lt.s32.totalorder %s855_s7, %s851_s28 }
 0x138   : > { %p853_p2 = pnand %p852_p0, %p1074_p4 }
 0x139   : > { %p858_p3 = por %p857_p1, %p856_p8 }
 0x13a   : > { %p854_p5 = pneg %p853_p2 }
 0x13b   : > { %v383_v17 = vpop.permute.xlu1 %382 }
 0x13c   : > { %633 = vst.msk [vmem:[%s1120_s17 + $0x18] sm:$0xff] %vm331_vm1, %v383_v17  ;;  %v373_v18 = vpop.permute.xlu0 %372  ;;  %p859_p9 = pnand %p858_p3, %p854_p5 }
 0x13d   : > { %631 = vst.msk [vmem:[%s1115_s30 + $0x18] sm:$0xff] %vm331_vm1, %v373_v18 }
 0x13e   : > { %862 = shalt.err (!%p859_p9)
}
 0x13f   : > { %s1257_s8 = smov 128   ;;  %s877_s30 = sshra.s32 %s450_s25, 4  ;;  %s878_s30 = int_to_ptr.hbm [resolvable:$true] %s877_s30 }
 0x140   : > { %654 = dma.vmem_to_hbm [thread:$0]  (%p1074_p4), %s412_s10, 512, %s414_s0, %s388_s29, %s1257_s8, %s1257_s8, %s970_s26  }
 0x141   : > { %s879_s17 = scalar_lea.hbm %s878_s30, 32  ;;  %s883_s28 = scalar_lea.hbm %s1246_s5, 64 }
 0x142   : > { %p880_p10 = scmp.ne.s32.totalorder %s878_s30, %s879_s17  ;;  %p884_p13 = scmp.lt.s32.totalorder %s878_s30, %s1246_s5 }
 0x143   : > { %p885_p0 = scmp.lt.s32.totalorder %s883_s28, %s879_s17 }
 0x144   : > { %p881_p11 = pnand %p880_p10, %p1074_p4 }
 0x145   : > { %p886_p2 = por %p885_p0, %p884_p13 }
 0x146   : > { %p882_p12 = pneg %p881_p11 }
 0x148   : > { %p887_p5 = pnand %p886_p2, %p882_p12 }
 0x14a   : > { %890 = shalt.err (!%p887_p5)
}
 0x14b   : > { %656 = dma.vmem_to_hbm [thread:$0]  (%p1074_p4), %s1176_s27, 512, %s450_s25, %s1141_s21, %s1257_s8, %s1257_s8, %s970_s26  }
 0x14c PF: > { %s464_s0 = sand.u32 1, %s933_s18   ;;  %p669_p8 = pnand %p615_p6, %p1082_p7 }
 0x14d   : > { %s465_s10 = scalar_lea.sflag [#allocation4], %s464_s0 }
 0x14e   : > { %p670_p1 = pneg %p669_p8 }
 0x150   : > { %924 = dma.done.wait (%p670_p1), %s465_s10, 512  }
 0x151   : > { %926 = vsyncadd (%p670_p1), %s465_s10, 4294966784  ;;  %s1258_s14 = sadd.s32 4294967294, %s953_s23  }
 0x152   : > { %s474_s29 = sand.u32 1, %s1258_s14  }
 0x153   : > { %s475_s7 = scalar_lea.sflag [#allocation9], %s474_s29 }
 0x154   : > { %928 = dma.done.wait (%p670_p1), %s475_s7, 1024  }
 0x155   : > { %930 = vsyncadd (%p670_p1), %s475_s7, 4294966272  ;;  %s26_s23 = sadd.s32 1, %s953_s23   ;;  %s1259_s18 = smov %s937_s19 }
 0x156   : > { %p23_p4 = scmp.ge.s32.totalorder %s26_s23, 4   ;;  %s1260_s19 = smov %s941_s20 }
 0x157   : > { %s1261_s20 = smov %s1080_s15  ;;  %s1262_s21 = smov %s949_s22 }
 0x158   : > { %s1263_s22 = smov %s1265_s9  ;;  %25 = sbr.rel (!%p23_p4) target bundleno = 11 (0xb), region = 122 }
 0x15d   :  { %491 = vsyncpa [#allocation3], 1 }
 0x15e   :  { %493 = vsyncpa [#allocation3 + $0x1], 1 }
 0x15f   :  { %494 = vsyncpa [#allocation6], 1 }
 0x160   :  { %495 = vsyncpa [#allocation4], 1 }
 0x161   :  { %497 = vsyncpa [#allocation4 + $0x1], 1 }
 0x162   :  { %498 = vsyncpa [#allocation9], 1 }
 0x163   :  { %500 = vsyncpa [#allocation9 + $0x1], 1 }

</bundles_post_ra>
